<compile_context>
chip_gen: v7x
topology: tpu7x:2x2x1
jax: 0.10.0
libtpu: 0.0.40
codegen_flags: <defaults>
</compile_context>

<pallas_src>
import jax
import jax.numpy as jnp
from jax.experimental import pallas as pl
from jax.experimental.pallas import tpu as pltpu


def _round_up(x: int, m: int) -> int:
    return (x + m - 1) // m * m


def ffn_kernel(x_ref, w1_ref, b1_ref, w2_ref, b2_ref, o_ref, acc_ref):
    h_idx = pl.program_id(1)

    @pl.when(h_idx == 0)
    def _():
        acc_ref[...] = jnp.zeros_like(acc_ref)

    # First linear for this hidden chunk: (TM, E_pad) @ (E_pad, TH) -> f32, +b1, ReLU.
    x = x_ref[...].astype(w1_ref.dtype)            # bf16 MXU operands when requested
    h = jnp.dot(x, w1_ref[...], preferred_element_type=jnp.float32)
    h = jnp.maximum(h + b1_ref[...], 0.0)
    # TODO(synk): training-mode dropout (pltpu.prng_seed + stateful_bernoulli +
    # 1/(1-p) scaling) not implemented; this matches nn.Dropout in eval() / p=0.

    # Second linear: accumulate this hidden chunk's contribution into f32 scratch.
    acc_ref[...] += jnp.dot(h.astype(w2_ref.dtype), w2_ref[...],
                            preferred_element_type=jnp.float32)

    @pl.when(h_idx == pl.num_programs(1) - 1)
    def _():
        o_ref[...] = (acc_ref[...] + b2_ref[...]).astype(o_ref.dtype)


def _choose_th(e_pad, hidden, w_itemsize, th_max, weight_budget=24 << 20):
    """Hidden-chunk size: multiple of 128, double-buffered W chunks within budget."""
    th = min(th_max, _round_up(hidden, 128))
    while th > 128 and 4 * e_pad * th * w_itemsize > weight_budget:
        th = _round_up(th // 2, 128)
    return th


def _choose_tm(n_rows, tm_max, row_align):
    if n_rows >= 2 * tm_max:
        return tm_max
    if n_rows <= row_align:
        return row_align
    # Prefer >=2 row-grid steps so the "parallel" axis can split across the two
    # TensorCores on v7x, while keeping sublane alignment for the compute dtype.
    return min(_round_up((n_rows + 1) // 2, row_align), tm_max)


def prepare_ffn_params(w1_t, b1, w2_t, b2, *, compute_dtype=jnp.float32, th_max=2048):
    """One-time weight prep (padding/cast hoisted out of the per-call hot path).

    w1_t: (E, H); b1: (1, H); w2_t: (H, E); b2: (1, E).  Features padded to lane
    multiples, H padded to a multiple of the hidden tile TH, weights cast to
    `compute_dtype` (bf16 recommended for MXU rate); biases stay f32."""
    E, H = w1_t.shape
    E_pad = _round_up(E, 128)
    w_itemsize = jnp.dtype(compute_dtype).itemsize
    TH = _choose_th(E_pad, H, w_itemsize, th_max)
    H_pad = _round_up(H, TH)
    w1_p = jnp.pad(w1_t, ((0, E_pad - E), (0, H_pad - H))).astype(compute_dtype)
    w2_p = jnp.pad(w2_t, ((0, H_pad - H), (0, E_pad - E))).astype(compute_dtype)
    b1_p = jnp.pad(jnp.asarray(b1, jnp.float32).reshape(1, H),
                   ((0, 0), (0, H_pad - H)))
    b2_p = jnp.pad(jnp.asarray(b2, jnp.float32).reshape(1, E),
                   ((0, 0), (0, E_pad - E)))
    return dict(w1=w1_p, b1=b1_p, w2=w2_p, b2=b2_p,
                E=E, H=H, E_pad=E_pad, H_pad=H_pad, TH=TH)


def ffn_forward(x, params, *, tm_max=256):
    """x: (..., E); params: output of prepare_ffn_params."""
    orig_shape = x.shape
    E, E_pad, H_pad, TH = params["E"], params["E_pad"], params["H_pad"], params["TH"]
    assert orig_shape[-1] == E
    N = 1
    for d in orig_shape[:-1]:
        N *= d
    x2 = x.reshape(N, E)

    w_itemsize = jnp.dtype(params["w1"].dtype).itemsize
    x_itemsize = jnp.dtype(x.dtype).itemsize
    row_align = 16 if w_itemsize == 2 else 8
    TM = _choose_tm(N, tm_max, row_align)
    N_pad = _round_up(N, TM)
    x_p = jnp.pad(x2, ((0, N_pad - N), (0, E_pad - E)))

    grid = (N_pad // TM, H_pad // TH)          # rows parallel, hidden reduction last

    # VMEM budget: double-buffered x/out/W1/b1/W2 tiles + single-buffered b2 +
    # the f32 accumulator scratch + the (TM, TH) hidden activation, with headroom.
    need = (2 * TM * E_pad * x_itemsize            # x tile (double buffered)
            + 2 * TM * E_pad * x_itemsize          # out tile
            + 2 * E_pad * TH * w_itemsize          # W1 chunk
            + 2 * TH * E_pad * w_itemsize          # W2 chunk
            + 2 * 8 * TH * 4 + 8 * E_pad * 4       # b1 (x2), b2 (x1)
            + TM * E_pad * 4                       # accumulator scratch
            + TM * TH * 4)                         # hidden activation value
    vmem_limit = min(max(int(need * 1.4) + (1 << 20), 16 << 20), 64 << 20)

    out = pl.pallas_call(
        ffn_kernel,
        out_shape=jax.ShapeDtypeStruct((N_pad, E_pad), x.dtype),
        grid_spec=pltpu.PrefetchScalarGridSpec(
            num_scalar_prefetch=0,
            grid=grid,
            in_specs=[
                pl.BlockSpec((TM, E_pad), lambda i, h: (i, 0)),     # x rows
                pl.BlockSpec((E_pad, TH), lambda i, h: (0, h)),     # W1 hidden chunk
                pl.BlockSpec((1, TH), lambda i, h: (0, h)),         # b1 hidden chunk
                pl.BlockSpec((TH, E_pad), lambda i, h: (h, 0)),     # W2 hidden chunk
                pl.BlockSpec((1, E_pad), lambda i, h: (0, 0),       # b2: grid-invariant
                             pipeline_mode=pl.Buffered(1)),
            ],
            out_specs=pl.BlockSpec((TM, E_pad), lambda i, h: (i, 0)),
            scratch_shapes=[pltpu.VMEM((TM, E_pad), jnp.float32)],
        ),
        compiler_params=pltpu.CompilerParams(
            dimension_semantics=("parallel", "arbitrary"),
            vmem_limit_bytes=vmem_limit,
        ),
    )(x_p, params["w1"], params["b1"], params["w2"], params["b2"])

    return out[:N, :E].reshape(orig_shape)


def init_ffn_params(key, embed_size, expansion_rate, dtype=jnp.float32):
    """Mirror nn.Linear init: uniform(-1/sqrt(fan_in), 1/sqrt(fan_in)).
    Weights are stored transposed (in_dim, out_dim) so the kernel does x @ W."""
    hidden = embed_size * expansion_rate
    k1, k2, k3, k4 = jax.random.split(key, 4)
    bound1 = 1.0 / (embed_size ** 0.5)
    bound2 = 1.0 / (hidden ** 0.5)
    w1_t = jax.random.uniform(k1, (embed_size, hidden), dtype, -bound1, bound1)
    b1 = jax.random.uniform(k2, (1, hidden), dtype, -bound1, bound1)
    w2_t = jax.random.uniform(k3, (hidden, embed_size), dtype, -bound2, bound2)
    b2 = jax.random.uniform(k4, (1, embed_size), dtype, -bound2, bound2)
    return w1_t, b1, w2_t, b2


if __name__ == "__main__":
    # FFN(embed_size=96, expansion_rate=4, dropout=0.0); x: (batch=2, seq=8, 96).
    embed_size, expansion_rate = 96, 4
    batch, seq = 2, 8
    key = jax.random.PRNGKey(0)
    kx, kp = jax.random.split(key)
    x = jax.random.normal(kx, (batch, seq, embed_size), jnp.float32)
    w1_t, b1, w2_t, b2 = init_ffn_params(kp, embed_size, expansion_rate)

    # Plain-JAX reference of the same forward (dropout is identity in eval mode).
    h_ref = jnp.maximum(x.reshape(-1, embed_size) @ w1_t + b1, 0.0)
    ref = (h_ref @ w2_t + b2).reshape(x.shape)

    # f32 compute path (tight tolerance).
    params_f32 = prepare_ffn_params(w1_t, b1, w2_t, b2, compute_dtype=jnp.float32)
    out_f32 = ffn_forward(x, params_f32)
    jax.block_until_ready(out_f32)
    assert out_f32.shape == x.shape
    err32 = float(jnp.max(jnp.abs(out_f32 - ref)))
    assert jnp.allclose(out_f32, ref, atol=1e-4, rtol=1e-4), err32

    # bf16 MXU path (perf-review item: bf16 operands for peak MXU rate on v5e/v6e/v7x).
    params_bf16 = prepare_ffn_params(w1_t, b1, w2_t, b2, compute_dtype=jnp.bfloat16)
    out_bf16 = ffn_forward(x, params_bf16)
    jax.block_until_ready(out_bf16)
    err16 = float(jnp.max(jnp.abs(out_bf16 - ref)))
    assert jnp.allclose(out_bf16, ref, atol=5e-2, rtol=5e-2), err16

    print("KERNEL_OK")
</pallas_src>

<mosaic_0001>
module attributes {stable_mosaic.version = 11 : i64} {
  func.func @ffn_kernel(%arg0: i32, %arg1: i32, %arg2: memref<8x128xf32, #tpu.memory_space<vmem>>, %arg3: memref<128x384xf32, #tpu.memory_space<vmem>>, %arg4: memref<1x384xf32, #tpu.memory_space<vmem>>, %arg5: memref<384x128xf32, #tpu.memory_space<vmem>>, %arg6: memref<1x128xf32, #tpu.memory_space<vmem>>, %arg7: memref<8x128xf32, #tpu.memory_space<vmem>>, %arg8: memref<8x128xf32, #tpu.memory_space<vmem>>) attributes {dimension_semantics = [#tpu.dimension_semantics<parallel>, #tpu.dimension_semantics<arbitrary>], iteration_bounds = array<i64: 2, 1>, scalar_prefetch = 0 : i64, scratch_operands = 1 : i64, tpu.core_type = #tpu.core_type<tc>, window_params = [{transform_indices = @transform_0, window_bounds = array<i64: 8, 128>}, {transform_indices = @transform_1, window_bounds = array<i64: 128, 384>}, {transform_indices = @transform_2, window_bounds = array<i64: 1, 384>}, {transform_indices = @transform_3, window_bounds = array<i64: 384, 128>}, {pipeline_mode = #tpu.pipeline_mode<synchronous>, transform_indices = @transform_4, window_bounds = array<i64: 1, 128>}, {transform_indices = @transform_5, window_bounds = array<i64: 8, 128>}]} {
    %c0_i32 = arith.constant 0 : i32
    %0 = arith.cmpi eq, %arg1, %c0_i32 : i32
    %1 = arith.extui %0 : i1 to i32
    %c0_i32_0 = arith.constant 0 : i32
    %2 = arith.cmpi ne, %1, %c0_i32_0 : i32
    scf.if %2 {
      %cst_16 = arith.constant 0.000000e+00 : f32
      %19 = vector.broadcast %cst_16 : f32 to vector<8x128xf32>
      %c0_17 = arith.constant 0 : index
      %c0_18 = arith.constant 0 : index
      %20 = vector.load %arg8[%c0_17, %c0_18] : memref<8x128xf32, #tpu.memory_space<vmem>>, vector<8x128xf32>
      tpu.vector_store %arg8[%c0_17, %c0_18], %19 {strides = array<i32>} : memref<8x128xf32, #tpu.memory_space<vmem>>, vector<8x128xf32>,
    } else {
    }
    %c0 = arith.constant 0 : index
    %c0_1 = arith.constant 0 : index
    %3 = vector.load %arg2[%c0, %c0_1] : memref<8x128xf32, #tpu.memory_space<vmem>>, vector<8x128xf32>
    %c0_2 = arith.constant 0 : index
    %c0_3 = arith.constant 0 : index
    %4 = vector.load %arg3[%c0_2, %c0_3] : memref<128x384xf32, #tpu.memory_space<vmem>>, vector<128x384xf32>
    %cst = arith.constant dense<0.000000e+00> : vector<8x384xf32>
    %5 = tpu.matmul %3, %4, %cst {dimension_numbers = #tpu.dot_dimension_numbers<[1], [0], [0], [1], [0, 0, 1, 1], [], []>} : vector<8x128xf32>, vector<128x384xf32>, vector<8x384xf32> -> vector<8x384xf32>
    %c0_4 = arith.constant 0 : index
    %c0_5 = arith.constant 0 : index
    %6 = vector.load %arg4[%c0_4, %c0_5] : memref<1x384xf32, #tpu.memory_space<vmem>>, vector<1x384xf32>
    %7 = vector.broadcast %6 : vector<1x384xf32> to vector<8x384xf32>
    %8 = arith.addf %5, %7 : vector<8x384xf32>
    %cst_6 = arith.constant 0.000000e+00 : f32
    %9 = vector.broadcast %cst_6 : f32 to vector<8x384xf32>
    %10 = arith.maximumf %8, %9 : vector<8x384xf32>
    %c0_7 = arith.constant 0 : index
    %c0_8 = arith.constant 0 : index
    %11 = vector.load %arg8[%c0_7, %c0_8] : memref<8x128xf32, #tpu.memory_space<vmem>>, vector<8x128xf32>
    %c0_9 = arith.constant 0 : index
    %c0_10 = arith.constant 0 : index
    %12 = vector.load %arg5[%c0_9, %c0_10] : memref<384x128xf32, #tpu.memory_space<vmem>>, vector<384x128xf32>
    %cst_11 = arith.constant dense<0.000000e+00> : vector<8x128xf32>
    %13 = tpu.matmul %10, %12, %cst_11 {dimension_numbers = #tpu.dot_dimension_numbers<[1], [0], [0], [1], [0, 0, 1, 1], [], []>} : vector<8x384xf32>, vector<384x128xf32>, vector<8x128xf32> -> vector<8x128xf32>
    %14 = arith.addf %11, %13 : vector<8x128xf32>
    %c0_12 = arith.constant 0 : index
    %c0_13 = arith.constant 0 : index
    %15 = vector.load %arg8[%c0_12, %c0_13] : memref<8x128xf32, #tpu.memory_space<vmem>>, vector<8x128xf32>
    tpu.vector_store %arg8[%c0_12, %c0_13], %14 {strides = array<i32>} : memref<8x128xf32, #tpu.memory_space<vmem>>, vector<8x128xf32>,
    %c0_i32_14 = arith.constant 0 : i32
    %16 = arith.cmpi eq, %arg1, %c0_i32_14 : i32
    %17 = arith.extui %16 : i1 to i32
    %c0_i32_15 = arith.constant 0 : i32
    %18 = arith.cmpi ne, %17, %c0_i32_15 : i32
    scf.if %18 {
      %c0_16 = arith.constant 0 : index
      %c0_17 = arith.constant 0 : index
      %19 = vector.load %arg8[%c0_16, %c0_17] : memref<8x128xf32, #tpu.memory_space<vmem>>, vector<8x128xf32>
      %c0_18 = arith.constant 0 : index
      %c0_19 = arith.constant 0 : index
      %20 = vector.load %arg6[%c0_18, %c0_19] : memref<1x128xf32, #tpu.memory_space<vmem>>, vector<1x128xf32>
      %21 = vector.broadcast %20 : vector<1x128xf32> to vector<8x128xf32>
      %22 = arith.addf %19, %21 : vector<8x128xf32>
      %c0_20 = arith.constant 0 : index
      %c0_21 = arith.constant 0 : index
      %23 = vector.load %arg7[%c0_20, %c0_21] : memref<8x128xf32, #tpu.memory_space<vmem>>, vector<8x128xf32>
      tpu.vector_store %arg7[%c0_20, %c0_21], %22 {strides = array<i32>} : memref<8x128xf32, #tpu.memory_space<vmem>>, vector<8x128xf32>,
    } else {
    }
    return
  }
  func.func @transform_0(%arg0: i32, %arg1: i32) -> (i32, i32) {
    %c0_i32 = arith.constant 0 : i32
    %c0_i32_0 = arith.constant 0 : i32
    return %arg0, %c0_i32 : i32, i32
  }
  func.func @transform_1(%arg0: i32, %arg1: i32) -> (i32, i32) {
    %c0_i32 = arith.constant 0 : i32
    %c0_i32_0 = arith.constant 0 : i32
    return %c0_i32, %arg1 : i32, i32
  }
  func.func @transform_2(%arg0: i32, %arg1: i32) -> (i32, i32) {
    %c0_i32 = arith.constant 0 : i32
    %c0_i32_0 = arith.constant 0 : i32
    return %c0_i32, %arg1 : i32, i32
  }
  func.func @transform_3(%arg0: i32, %arg1: i32) -> (i32, i32) {
    %c0_i32 = arith.constant 0 : i32
    %c0_i32_0 = arith.constant 0 : i32
    return %arg1, %c0_i32 : i32, i32
  }
  func.func @transform_4(%arg0: i32, %arg1: i32) -> (i32, i32) {
    %c0_i32 = arith.constant 0 : i32
    %c0_i32_0 = arith.constant 0 : i32
    %c0_i32_1 = arith.constant 0 : i32
    return %c0_i32, %c0_i32_0 : i32, i32
  }
  func.func @transform_5(%arg0: i32, %arg1: i32) -> (i32, i32) {
    %c0_i32 = arith.constant 0 : i32
    %c0_i32_0 = arith.constant 0 : i32
    return %arg0, %c0_i32 : i32, i32
  }
}

</mosaic_0001>

<bundles_post_ra>
// kernel: tpu_custom_call.1
= control target key start
LH: loop header
LB: loop body
LE: loop exit
PB: predicated region body
PF: predicated region fallthrough
CT: control target
= control target key end

     0   :  { %10 = vsyncpa [#allocation4], 0  ;;  %s1723_s0 = inlined_call_operand.hbm [shape: f32[16,128], index: 0, kind: input, shape index: {}]   ;;  %s1724_s1 = inlined_call_operand.hbm [shape: f32[128,384], index: 1, kind: input, shape index: {}]   ;;  %s1725_s2 = inlined_call_operand.vmem [shape: f32[1,384], index: 2, kind: input, shape index: {}]   ;;  %s1726_s3 = inlined_call_operand.hbm [shape: f32[384,128], index: 3, kind: input, shape index: {}]   ;;  %s1727_s4 = inlined_call_operand.vmem [shape: f32[1,128], index: 4, kind: input, shape index: {}]   ;;  %s1728_s5 = inlined_call_operand.hbm [shape: f32[16,128], index: 5, kind: output, shape index: {}]  }
   0x1   :  { %12 = vsyncpa [#allocation4 + $0x1], 0 }
   0x2   :  { %13 = vsyncpa [#allocation7], 0 }
   0x3   :  { %14 = vsyncpa [#allocation5], 0 }
   0x4   :  { %16 = vsyncpa [#allocation5 + $0x1], 0  ;;  %s1439_s18 = smov 0   ;;  %s1441_s19 = smov 0  }
   0x5   :  { %s1443_s20 = smov 0   ;;  %s1445_s21 = smov 0  }
   0x6   :  { %s1447_s22 = smov 0   ;;  %s1449_s23 = smov 0  }
   0x7 LB: > { %s864_s24 = sadd.s32 4294967295, %s1396_s23   ;;  %s865_s25 = sadd.s32 4294967294, %s1396_s23   ;;  %s1396_s23 = sphi %s1449_s23, %s22_s23   ;;  %s1392_s22 = sphi %s1447_s22, %s1750_s22   ;;  %s1388_s21 = sphi %s1445_s21, %s1749_s21   ;;  %s1384_s20 = sphi %s1443_s20, %s1748_s20   ;;  %s1380_s19 = sphi %s1441_s19, %s1747_s19   ;;  %s1376_s18 = sphi %s1439_s18, %s1746_s18  }
   0x8   : > { %p54_p0 = scmp.ne.s32.totalorder %s1380_s19, %s1376_s18  ;;  %p1473_p1 = scmp.eq.s32.totalorder %s864_s24, 0 }
   0x9   : > { %p1477_p2 = scmp.eq.s32.totalorder %s864_s24, 1  ;;  %p183_p3 = scmp.eq.s32.totalorder %s865_s25, 1 }
   0xa   : > { %s1733_s26 = scalar_select %p1473_p1, 1, 0 }
   0xb   : > { %p1483_p4 = por %p1473_p1, %p54_p0  ;;  %p866_p5 = scmp.ge.s32.totalorder %s1396_s23, 1 }
   0xc   : > { %p1488_p6 = por %p183_p3, %p54_p0  ;;  %p190_p7 = scmp.lt.s32.totalorder %s1396_s23, 3 }
   0xd   : > { %s1735_s28 = scalar_select %p1483_p4, 1, 0 }
   0xe   : > { %s1736_s29 = scalar_select %p1488_p6, 1, 0 }
   0xf   : > { %p1493_p8 = pnand %p866_p5, %p190_p7  ;;  %s1398_s6 = smov [#allocation6]  }
  0x10   : > { %s205_s7 = sshll.u32 %s1398_s6, 4  ;;  %s1399_s9 = smov [#allocation8]   ;;  %s1497_s7 = int_to_ptr.vmem [resolvable:$true] %s205_s7 }
  0x11   : > { %p1146_p9 = pneg %p1493_p8  ;;  %s229_s10 = sshll.u32 %s1399_s9, 4  ;;  %s1508_s10 = int_to_ptr.vmem [resolvable:$true] %s229_s10 }
  0x12   : > { %s1224_s13 = scalar_lea.hbm %s1724_s1, 6144 }
  0x13   : > { %p1504_p11 = pnand %p1146_p9, %p1473_p1  ;;  %p1225_p12 = scmp.ne.s32.totalorder %s1724_s1, %s1224_s13 }
  0x14   : > { %p1231_p5 = scmp.lt.u32.totalorder %s1224_s13, %s1724_s1 }
  0x15   : > { %p1226_p13 = pneg %p1504_p11 }
  0x17   : > { %p1227_p0 = pnand %p1226_p13, %p1225_p12 }
  0x19   : > { %p1228_p3 = pneg %p1227_p0 }
  0x1b   : > { %p1233_p7 = pnand %p1231_p5, %p1228_p3 }
  0x1d   : > { %1236 = shalt.err (!%p1233_p7)
}
  0x1e   : > { %s1237_s24 = scalar_lea.vmem %s1497_s7, 6144  ;;  %p1245_p1 = scmp.lt.s32.totalorder %s1497_s7, %s1497_s7 }
  0x1f   : > { %p1238_p9 = scmp.ne.s32.totalorder %s1497_s7, %s1237_s24  ;;  %p1246_p12 = scmp.lt.s32.totalorder %s1237_s24, %s1237_s24 }
  0x21   : > { %p1240_p10 = pnand %p1238_p9, %p1226_p13  ;;  %p1247_p0 = por %p1246_p12, %p1245_p1 }
  0x23   : > { %p1241_p6 = pneg %p1240_p10 }
  0x25   : > { %p1248_p4 = pnand %p1247_p0, %p1241_p6 }
  0x27   : > { %1251 = shalt.err (!%p1248_p4)
}
  0x28   : > { %s1400_s25 = smov 384   ;;  %s1401_s6 = smov 24  }
  0x29   : > { %1149 = dma.hbm_to_vmem [thread:$0]  (!%p1504_p11), %s1724_s1, 6144, %s1497_s7, [#allocation7], %s1400_s25, %s1400_s25, %s1401_s6  }
  0x2a   : > { %s1252_s14 = scalar_lea.hbm %s1726_s3, 6144 }
  0x2b   : > { %p1253_p1 = scmp.ne.s32.totalorder %s1726_s3, %s1252_s14  ;;  %p1259_p10 = scmp.lt.u32.totalorder %s1252_s14, %s1726_s3 }
  0x2d   : > { %p1255_p4 = pnand %p1253_p1, %p1226_p13 }
  0x2f   : > { %p1256_p6 = pneg %p1255_p4 }
  0x31   : > { %p1261_p3 = pnand %p1259_p10, %p1256_p6 }
  0x33   : > { %1264 = shalt.err (!%p1261_p3)
}
  0x34   : > { %s1265_s7 = scalar_lea.vmem %s1508_s10, 6144  ;;  %p1273_p12 = scmp.lt.s32.totalorder %s1508_s10, %s1508_s10 }
  0x35   : > { %p1266_p5 = scmp.ne.s32.totalorder %s1508_s10, %s1265_s7  ;;  %p1274_p0 = scmp.lt.s32.totalorder %s1265_s7, %s1265_s7 }
  0x37   : > { %p1268_p7 = pnand %p1266_p5, %p1226_p13  ;;  %p1275_p1 = por %p1274_p0, %p1273_p12 }
  0x39   : > { %p1269_p9 = pneg %p1268_p7 }
  0x3b   : > { %p1276_p4 = pnand %p1275_p1, %p1269_p9 }
  0x3d   : > { %1279 = shalt.err (!%p1276_p4)
}
  0x3e   : > { %s1402_s25 = smov 128   ;;  %s1403_s6 = smov 8  }
  0x3f   : > { %1152 = dma.hbm_to_vmem [thread:$0]  (!%p1504_p11), %s1726_s3, 6144, %s1508_s10, [#allocation7], %s1402_s25, %s1402_s25, %s1403_s6  }
  0x40   : > { %s34_s12 = sadd.s32 1, %s1392_s22  ;;  %s41_s13 = sadd.s32 1, %s1384_s20 }
  0x41   : > { %p36_p13 = scmp.ge.s32.totalorder %s34_s12, 2  ;;  %p48_p6 = scmp.ne.s32.totalorder %s1384_s20, %s1380_s19 }
  0x42   : > { %p49_p10 = scmp.eq.s32.totalorder %s1396_s23, 0  ;;  %p1163_p3 = scmp.lt.s32.totalorder %s1396_s23, 2 }
  0x43   : > { %s1752_s12 = smov (%p36_p13, %s34_s12), 0  ;;  %p1572_p7 = por %p1477_p2, %p48_p6 }
  0x44   : > { %p50_p5 = por %p49_p10, %p48_p6  ;;  %s38_s8 = ssub.s32 %s1392_s22, %s1752_s12 }
  0x45   : > { %s1739_s14 = scalar_select %p1572_p7, 1, 0 }
  0x46   : > { %s246_s15 = sand.u32 1, %s1384_s20   ;;  %p39_p9 = scmp.eq.s32.totalorder %s38_s8, 0 }
  0x47   : > { %s871_s10 = sshll.u32 %s246_s15, 3  ;;  %s872_s16 = sshll.u32 %s1392_s22, 7 }
  0x48   : > { %s1581_s17 = scalar_select %p39_p9, %s1384_s20, %s41_s13  }
  0x49   : > { %s1586_s25 = scalar_lea.hbm %s1723_s0, %s872_s16  ;;  %s250_s27 = scalar_lea.vmem [#allocation3], %s871_s10 }
  0x4a   : > { %s257_s6 = sshll.u32 %s250_s27, 4  ;;  %p1590_p2 = pnand %p1163_p3, %p50_p5  ;;  %s1594_s6 = int_to_ptr.vmem [resolvable:$true] %s257_s6 }
  0x4b   : > { %s247_s11 = scalar_lea.sflag [#allocation4], %s246_s15  ;;  %s1280_s13 = scalar_lea.hbm %s1586_s25, 128 }
  0x4c   : > { %p1281_p11 = scmp.ne.s32.totalorder %s1586_s25, %s1280_s13  ;;  %p1282_p12 = pneg %p1590_p2 }
  0x4d   : > { %s1285_s16 = scalar_lea.hbm %s1723_s0, 256  ;;  %p1286_p4 = scmp.lt.u32.totalorder %s1586_s25, %s1723_s0 }
  0x4e   : > { %p1283_p0 = pnand %p1282_p12, %p1281_p11  ;;  %p1287_p13 = scmp.lt.u32.totalorder %s1285_s16, %s1280_s13 }
  0x4f   : > { %p1289_p10 = scmp.lt.u32.totalorder %s1280_s13, %s1586_s25 }
  0x50   : > { %p1284_p1 = pneg %p1283_p0  ;;  %p1288_p6 = por %p1287_p13, %p1286_p4 }
  0x52   : > { %p1290_p3 = por %p1289_p10, %p1288_p6 }
  0x54   : > { %p1291_p5 = pnand %p1290_p3, %p1284_p1 }
  0x56   : > { %1294 = shalt.err (!%p1291_p5)
}
  0x57   : > { %s1295_s15 = scalar_lea.vmem %s1594_s6, 128  ;;  %s1404_s27 = smov [#allocation3]  }
  0x58   : > { %p1296_p9 = scmp.ne.s32.totalorder %s1594_s6, %s1295_s15  ;;  %s1300_s8 = sshll.u32 %s1404_s27, 4  ;;  %s1301_s8 = int_to_ptr.vmem [resolvable:$false] %s1300_s8 }
  0x59   : > { %s1302_s10 = scalar_lea.vmem %s1301_s8, 256  ;;  %p1303_p7 = scmp.lt.s32.totalorder %s1594_s6, %s1301_s8 }
  0x5a   : > { %p1298_p11 = pnand %p1296_p9, %p1282_p12  ;;  %p1304_p4 = scmp.lt.s32.totalorder %s1302_s10, %s1295_s15 }
  0x5c   : > { %p1299_p0 = pneg %p1298_p11  ;;  %p1305_p13 = por %p1304_p4, %p1303_p7 }
  0x5e   : > { %p1306_p6 = pnand %p1305_p13, %p1299_p0 }
  0x60   : > { %1309 = shalt.err (!%p1306_p6)
}
  0x61   : > { %1156 = dma.hbm_to_vmem [thread:$0]  (!%p1590_p2), %s1586_s25, 128, %s1594_s6, %s247_s11  }
  0x62   : > { %266 = sbr.rel (%p1493_p8) target bundleno = 596 (0x254), region = 40  ;;  %s1624_s13 = sand.u32 (!%p1493_p8), 1, %s1380_s19  }
  0x63   : > { %s874_s16 = sshll.u32 (!%p1493_p8), %s1624_s13, 3  ;;  %s269_s24 = scalar_lea.sflag (!%p1493_p8), [#allocation4], %s1624_s13 }
  0x64   : > { %s1630_s7 = scalar_lea.vmem (!%p1493_p8), [#allocation3], %s874_s16  ;;  %p1741_p7 = scmp.ne.s32.totalorder (!%p1493_p8), %s1735_s28, 0 }
  0x69   : > { %1363 = dma.done.wait (%p1741_p7), %s269_s24, 128  }
  0x6a   : > { %1365 = vsyncadd (%p1741_p7), %s269_s24, 4294967168  ;;  %p1742_p2 = scmp.ne.s32.totalorder %s1733_s26, 0 }
  0x6c   : > { %1367 = dma.done.wait (%p1742_p2), [#allocation7], 12288  }
  0x6d   : > { %1369 = vsyncadd (%p1742_p2), [#allocation7], 4294955008  ;;  %v1405_v0 = vmov 0.0|0.0   ;;  %v1406_v1 = vmov 0.0   ;;  %vm1407_vm0 = vmmov 0   ;;  %v325_v2 = vld [vmem:[#allocation6 + $0x8] sm:$0xff] }
  0x6e   : > { %1054 = vmatprep.subr.bf16.mxu1 %v1405_v0  ;;  %453 = vmatprep.mubr.f32.mxu0 %v1406_v1  ;;  %v328_v3 = vld [vmem:[#allocation6 + $0x20] sm:$0xff]  ;;  %v327_v6 = vld [vmem:[#allocation6 + $0x18] sm:$0xff]  ;;  %v334_v8 = vld [vmem:[#allocation6 + $0x50] sm:$0xff]  ;;  %s880_s6 = sshll.u32 %s1388_s21, 7  ;;  %s310_s9 = scalar_lea.vmem [#allocation9], %s874_s16 }
  0x6f   : > { %984 = vmatprep.mubr.msk.f32.mxu1 %vm1407_vm0, %v1406_v1  ;;  %v324_v4 = vld [vmem:[#allocation6] sm:$0xff]  ;;  %v1022_v5 = vpack.c.bf16 %v328_v3, %v325_v2  ;;  %v331_v7 = vld [vmem:[#allocation6 + $0x38] sm:$0xff]  ;;  %v330_v11 = vld [vmem:[#allocation6 + $0x30] sm:$0xff]  ;;  %s751_s11 = sshll.u32 %s310_s9, 4  ;;  %s1674_s8 = scalar_lea.hbm %s1728_s5, %s880_s6  ;;  %s1676_s11 = int_to_ptr.vmem [resolvable:$true] %s751_s11 }
  0x70   : > { %v1024_v9 = vpack.c.bf16 %v327_v6, %v324_v4  ;;  %v1026_v10 = vpack.c.bf16 %v334_v8, %v331_v7  ;;  %v333_v12 = vld [vmem:[#allocation6 + $0x48] sm:$0xff]  ;;  %v326_v13 = vld [vmem:[#allocation6 + $0x10] sm:$0xff]  ;;  %v340_v16 = vld [vmem:[#allocation6 + $0x80] sm:$0xff]  ;;  %s738_s10 = scalar_lea.sflag [#allocation5], %s1624_s13  ;;  %s1310_s24 = scalar_lea.vmem %s1676_s11, 128 }
  0x71   : > { %1023 = vmatprep.subr.bf16.mxu0 %v1022_v5  ;;  %v329_v14 = vld [vmem:[#allocation6 + $0x28] sm:$0xff]  ;;  %v1028_v17 = vpack.c.bf16 %v333_v12, %v330_v11  ;;  %v332_v19 = vld [vmem:[#allocation6 + $0x40] sm:$0xff]  ;;  %v339_v22 = vld [vmem:[#allocation6 + $0x78] sm:$0xff]  ;;  %p1311_p8 = scmp.ne.s32.totalorder %s1676_s11, %s1310_s24  ;;  %p1743_p12 = scmp.ne.s32.totalorder %s1739_s14, 0 }
  0x72   : > { %v337_v15 = vld [vmem:[#allocation6 + $0x68] sm:$0xff]  ;;  %1025 = vmatpush1.bf16.msra.mxu0 %v1024_v9  ;;  %v1055_v18 = vpack.c.bf16 %v329_v14, %v326_v13  ;;  %v336_v21 = vld [vmem:[#allocation6 + $0x60] sm:$0xff]  ;;  %v335_v23 = vld [vmem:[#allocation6 + $0x58] sm:$0xff]  ;;  %s1408_s21 = smov [#allocation9]  }
  0x73   : > { %1027 = vmatprep.subr.bf16.mxu0 %v1026_v10  ;;  %v1030_v20 = vpack.c.bf16 %v340_v16, %v337_v15  ;;  %v1058_v24 = vpack.c.bf16 %v335_v23, %v332_v19  ;;  %v343_v25 = vld [vmem:[#allocation6 + $0x98] sm:$0xff]  ;;  %v346_v26 = vld [vmem:[#allocation6 + $0xb0] sm:$0xff]  ;;  %v341_v28 = vld [vmem:[#allocation6 + $0x88] sm:$0xff]  ;;  %v1032_v29 = vpack.c.bf16 %v339_v22, %v336_v21  ;;  %p1312_p1 = pnand %p1311_p8, %p1743_p12  ;;  %s1314_s16 = sshll.u32 %s1408_s21, 4  ;;  %s1315_s16 = int_to_ptr.vmem [resolvable:$false] %s1314_s16 }
  0x74   : > { %1056 = vmatpush3.bf16.msra.mxu1 %v1055_v18  ;;  %v338_v27 = vld [vmem:[#allocation6 + $0x70] sm:$0xff]  ;;  %v1034_v30 = vpack.c.bf16 %v346_v26, %v343_v25  ;;  %v345_v32 = vld [vmem:[#allocation6 + $0xa8] sm:$0xff]  ;;  %v352_v35 = vld [vmem:[#allocation6 + $0xe0] sm:$0xff]  ;;  %p1317_p3 = scmp.lt.s32.totalorder %s1676_s11, %s1315_s16 }
  0x75   : > { %1057 = vmatprep.subr.bf16.mxu1 %v1405_v0  ;;  %v342_v31 = vld [vmem:[#allocation6 + $0x90] sm:$0xff]  ;;  %v1061_v33 = vpack.c.bf16 %v341_v28, %v338_v27  ;;  %v349_v34 = vld [vmem:[#allocation6 + $0xc8] sm:$0xff]  ;;  %v344_v36 = vld [vmem:[#allocation6 + $0xa0] sm:$0xff]  ;;  %p1313_p10 = pneg %p1312_p1 }
  0x76   : > { %1029 = vmatpush1.bf16.msra.mxu0 %v1028_v17  ;;  %v347_v37 = vld [vmem:[#allocation6 + $0xb8] sm:$0xff]  ;;  %v1036_v38 = vpack.c.bf16 %v345_v32, %v342_v31  ;;  %v1038_v39 = vpack.c.bf16 %v352_v35, %v349_v34  ;;  %v348_v40 = vld [vmem:[#allocation6 + $0xc0] sm:$0xff]  ;;  %v358_v44 = vld [vmem:[#allocation6 + $0x110] sm:$0xff] }
  0x77   : > { %1031 = vmatprep.subr.bf16.mxu0 %v1030_v20  ;;  %v351_v41 = vld [vmem:[#allocation6 + $0xd8] sm:$0xff]  ;;  %v1064_v42 = vpack.c.bf16 %v347_v37, %v344_v36  ;;  %v350_v45 = vld [vmem:[#allocation6 + $0xd0] sm:$0xff]  ;;  %v353_v46 = vld [vmem:[#allocation6 + $0xe8] sm:$0xff] }
  0x78   : > { %1059 = vmatpush3.bf16.msra.mxu1 %v1058_v24  ;;  %v355_v43 = vld [vmem:[#allocation6 + $0xf8] sm:$0xff]  ;;  %v1040_v47 = vpack.c.bf16 %v351_v41, %v348_v40  ;;  %v354_v49 = vld [vmem:[#allocation6 + $0xf0] sm:$0xff]  ;;  %v357_v50 = vld [vmem:[#allocation6 + $0x108] sm:$0xff]  ;;  %v1067_v51 = vpack.c.bf16 %v353_v46, %v350_v45 }
  0x79   : > { %1060 = vmatprep.subr.bf16.mxu1 %v1405_v0  ;;  %v1042_v48 = vpack.c.bf16 %v358_v44, %v355_v43  ;;  %v361_v52 = vld [vmem:[#allocation6 + $0x128] sm:$0xff]  ;;  %v364_v53 = vld [vmem:[#allocation6 + $0x140] sm:$0xff]  ;;  %v359_v55 = vld [vmem:[#allocation6 + $0x118] sm:$0xff]  ;;  %v1044_v56 = vpack.c.bf16 %v357_v50, %v354_v49 }
  0x7a   : > { %1033 = vmatpush1.bf16.msra.mxu0 %v1032_v29  ;;  %v356_v54 = vld [vmem:[#allocation6 + $0x100] sm:$0xff]  ;;  %v1046_v57 = vpack.c.bf16 %v364_v53, %v361_v52  ;;  %v363_v59 = vld [vmem:[#allocation6 + $0x138] sm:$0xff]  ;;  %v370_v62 = vld [vmem:[#allocation6 + $0x170] sm:$0xff] }
  0x7b   : > { %1035 = vmatprep.subr.bf16.mxu0 %v1034_v30  ;;  %v360_v58 = vld [vmem:[#allocation6 + $0x120] sm:$0xff]  ;;  %v1070_v60 = vpack.c.bf16 %v359_v55, %v356_v54  ;;  %v367_v61 = vld [vmem:[#allocation6 + $0x158] sm:$0xff]  ;;  %v362_v63 = vld [vmem:[#allocation6 + $0x130] sm:$0xff] }
  0x7c   : > { %1062 = vmatpush3.bf16.msra.mxu1 %v1061_v33  ;;  %v365_v2 = vld [vmem:[#allocation6 + $0x148] sm:$0xff]  ;;  %v1048_v3 = vpack.c.bf16 %v363_v59, %v360_v58  ;;  %v1050_v4 = vpack.c.bf16 %v370_v62, %v367_v61  ;;  %v366_v5 = vld [vmem:[#allocation6 + $0x150] sm:$0xff]  ;;  %v550_v8 = vld [vmem:[#allocation8 + $0x80] sm:$0xff] }
  0x7d   : > { %1063 = vmatprep.subr.bf16.mxu1 %v1405_v0  ;;  %v369_v6 = vld [vmem:[#allocation6 + $0x168] sm:$0xff]  ;;  %v1073_v7 = vpack.c.bf16 %v365_v2, %v362_v63  ;;  %v368_v10 = vld [vmem:[#allocation6 + $0x160] sm:$0xff]  ;;  %v371_v11 = vld [vmem:[#allocation6 + $0x178] sm:$0xff] }
  0x7e   : > { %1037 = vmatpush1.bf16.msra.mxu0 %v1036_v38  ;;  %v551_v9 = vld [vmem:[#allocation8 + $0x88] sm:$0xff]  ;;  %v1052_v12 = vpack.c.bf16 %v369_v6, %v366_v5  ;;  %v534_v14 = vld [vmem:[#allocation8] sm:$0xff]  ;;  %v1076_v16 = vpack.c.bf16 %v371_v11, %v368_v10  ;;  %v552_v17 = vld [vmem:[#allocation8 + $0x90] sm:$0xff] }
  0x7f   : > { %1039 = vmatprep.subr.bf16.mxu0 %v1038_v39  ;;  %v1078_v13 = vpack.c.bf16 %v551_v9, %v550_v8  ;;  %v535_v15 = vld [vmem:[#allocation8 + $0x8] sm:$0xff]  ;;  %v553_v18 = vld [vmem:[#allocation8 + $0x98] sm:$0xff]  ;;  %v566_v19 = vld [vmem:[#allocation8 + $0x100] sm:$0xff] }
  0x80   : > { %1065 = vmatpush3.bf16.msra.mxu1 %v1064_v42  ;;  %v567_v20 = vld [vmem:[#allocation8 + $0x108] sm:$0xff]  ;;  %v323_v21 = vld [vmem:[%s1630_s7] sm:$0xff]  ;;  %v1080_v22 = vpack.c.bf16 %v535_v15, %v534_v14  ;;  %v1082_v23 = vpack.c.bf16 %v553_v18, %v552_v17  ;;  %v554_v27 = vld [vmem:[#allocation8 + $0xa0] sm:$0xff]  ;;  %s1316_s7 = scalar_lea.vmem %s1315_s16, 256 }
  0x81   : > { %1066 = vmatprep.subr.bf16.mxu1 %v1405_v0  ;;  %v536_v24 = vld [vmem:[#allocation8 + $0x10] sm:$0xff]  ;;  %v537_v25 = vld [vmem:[#allocation8 + $0x18] sm:$0xff]  ;;  %v1111_v26 = vpack.c.bf16 %v567_v20, %v566_v19  ;;  %v555_v28 = vld [vmem:[#allocation8 + $0xa8] sm:$0xff]  ;;  %p1318_p5 = scmp.lt.s32.totalorder %s1316_s7, %s1310_s24 }
  0x82   : > { %1041 = vmatpush1.bf16.msra.mxu0 %v1040_v47  ;;  %v568_v29 = vld [vmem:[#allocation8 + $0x110] sm:$0xff]  ;;  %v569_v30 = vld [vmem:[#allocation8 + $0x118] sm:$0xff]  ;;  %v1084_v31 = vpack.c.bf16 %v537_v25, %v536_v24  ;;  %v1086_v32 = vpack.c.bf16 %v555_v28, %v554_v27  ;;  %v538_v33 = vld [vmem:[#allocation8 + $0x20] sm:$0xff] }
  0x83   : > { %1043 = vmatprep.subr.bf16.mxu0 %v1042_v48  ;;  %v539_v34 = vld [vmem:[#allocation8 + $0x28] sm:$0xff]  ;;  %v1114_v35 = vpack.c.bf16 %v569_v30, %v568_v29  ;;  %v556_v36 = vld [vmem:[#allocation8 + $0xb0] sm:$0xff]  ;;  %v557_v37 = vld [vmem:[#allocation8 + $0xb8] sm:$0xff]  ;;  %p1319_p9 = por %p1318_p5, %p1317_p3 }
  0x84   : > { %1068 = vmatpush3.bf16.msra.mxu1 %v1067_v51  ;;  %v570_v38 = vld [vmem:[#allocation8 + $0x120] sm:$0xff]  ;;  %v571_v39 = vld [vmem:[#allocation8 + $0x128] sm:$0xff]  ;;  %v1088_v40 = vpack.c.bf16 %v539_v34, %v538_v33  ;;  %v1090_v41 = vpack.c.bf16 %v557_v37, %v556_v36  ;;  %v540_v42 = vld [vmem:[#allocation8 + $0x30] sm:$0xff] }
  0x85   : > { %1069 = vmatprep.subr.bf16.mxu1 %v1405_v0  ;;  %v541_v43 = vld [vmem:[#allocation8 + $0x38] sm:$0xff]  ;;  %v1117_v44 = vpack.c.bf16 %v571_v39, %v570_v38  ;;  %v558_v45 = vld [vmem:[#allocation8 + $0xc0] sm:$0xff]  ;;  %v559_v46 = vld [vmem:[#allocation8 + $0xc8] sm:$0xff]  ;;  %p1320_p11 = pnand %p1319_p9, %p1313_p10 }
  0x86   : > { %1045 = vmatpush1.bf16.msra.mxu0 %v1044_v56  ;;  %v572_v47 = vld [vmem:[#allocation8 + $0x130] sm:$0xff]  ;;  %v573_v48 = vld [vmem:[#allocation8 + $0x138] sm:$0xff]  ;;  %v1094_v49 = vpack.c.bf16 %v559_v46, %v558_v45  ;;  %v542_v50 = vld [vmem:[#allocation8 + $0x40] sm:$0xff] }
  0x87   : > { %1047 = vmatprep.subr.bf16.mxu0 %v1046_v57  ;;  %v543_v51 = vld [vmem:[#allocation8 + $0x48] sm:$0xff]  ;;  %v1120_v52 = vpack.c.bf16 %v573_v48, %v572_v47  ;;  %v560_v53 = vld [vmem:[#allocation8 + $0xd0] sm:$0xff]  ;;  %v561_v54 = vld [vmem:[#allocation8 + $0xd8] sm:$0xff] }
  0x88   : > { %1071 = vmatpush3.bf16.msra.mxu1 %v1070_v60  ;;  %v574_v55 = vld [vmem:[#allocation8 + $0x140] sm:$0xff]  ;;  %v575_v56 = vld [vmem:[#allocation8 + $0x148] sm:$0xff]  ;;  %v1096_v57 = vpack.c.bf16 %v543_v51, %v542_v50  ;;  %v1098_v58 = vpack.c.bf16 %v561_v54, %v560_v53  ;;  %v544_v59 = vld [vmem:[#allocation8 + $0x50] sm:$0xff] }
  0x89   : > { %1072 = vmatprep.subr.bf16.mxu1 %v1405_v0  ;;  %v545_v60 = vld [vmem:[#allocation8 + $0x58] sm:$0xff]  ;;  %v1123_v61 = vpack.c.bf16 %v575_v56, %v574_v55  ;;  %v562_v62 = vld [vmem:[#allocation8 + $0xe0] sm:$0xff]  ;;  %v563_v63 = vld [vmem:[#allocation8 + $0xe8] sm:$0xff] }
  0x8a   : > { %1049 = vmatpush1.bf16.msra.mxu0 %v1048_v3  ;;  %v576_v2 = vld [vmem:[#allocation8 + $0x150] sm:$0xff]  ;;  %v577_v3 = vld [vmem:[#allocation8 + $0x158] sm:$0xff]  ;;  %v1102_v5 = vpack.c.bf16 %v563_v63, %v562_v62  ;;  %v547_v8 = vld [vmem:[#allocation8 + $0x68] sm:$0xff] }
  0x8b   : > { %1051 = vmatprep.subr.bf16.mxu0 %v1050_v4  ;;  %v1100_v4 = vpack.c.bf16 %v545_v60, %v544_v59  ;;  %v1126_v6 = vpack.c.bf16 %v577_v3, %v576_v2  ;;  %v578_v10 = vld [vmem:[#allocation8 + $0x160] sm:$0xff]  ;;  %v579_v11 = vld [vmem:[#allocation8 + $0x168] sm:$0xff]  ;;  %v565_v14 = vld [vmem:[#allocation8 + $0xf8] sm:$0xff] }
  0x8c   : > { %1074 = vmatpush3.bf16.msra.mxu1 %v1073_v7  ;;  %v546_v7 = vld [vmem:[#allocation8 + $0x60] sm:$0xff]  ;;  %v549_v17 = vld [vmem:[#allocation8 + $0x78] sm:$0xff]  ;;  %v580_v19 = vld [vmem:[#allocation8 + $0x170] sm:$0xff] }
  0x8d   : > { %1075 = vmatprep.subr.bf16.mxu1 %v1405_v0  ;;  %v1104_v9 = vpack.c.bf16 %v547_v8, %v546_v7  ;;  %v581_v20 = vld [vmem:[#allocation8 + $0x178] sm:$0xff]  ;;  %v372_v25 = vld [vmem:[%s1725_s2] sm:$0x7] }
  0x8e   : > { %1053 = vmatpush1.bf16.msra.mxu0 %v1052_v12  ;;  %v1129_v12 = vpack.c.bf16 %v579_v11, %v578_v10  ;;  %v878_v45 = vld [vmem:[%s1727_s4] ss:$0 sm:$0xff] }
  0x8f   : > { %1079 = vmatprep.subr.bf16.mxu0 %v1078_v13  ;;  %v564_v13 = vld [vmem:[#allocation8 + $0xf0] sm:$0xff] }
  0x90   : > { %1077 = vmatpush3.bf16.msra.mxu1 %v1076_v16  ;;  %v1106_v15 = vpack.c.bf16 %v565_v14, %v564_v13  ;;  %v548_v16 = vld [vmem:[#allocation8 + $0x70] sm:$0xff] }
  0x91   : > { %454 = vmatmul.mubr.f32.vlgmr.msra.gmra.mrb[0].mxu0 %v323_v21  ;;  %1110 = vmatprep.subr.bf16.mxu1 %v1405_v0  ;;  %v1108_v18 = vpack.c.bf16 %v549_v17, %v548_v16 }
  0x92   : > { %1081 = vmatpush3.bf16.msra.mxu0 %v1080_v22  ;;  %v374_v22 = vlaneseq }
  0x93   : > { %985 = vmatmul.mubr.f32.vlgmr.msra.gmra.mrb[0].mxu1 %v323_v21  ;;  %1083 = vmatprep.subr.bf16.mxu0 %v1082_v23  ;;  %v1132_v21 = vpack.c.bf16 %v581_v20, %v580_v19 }
  0x94   : > { %1112 = vmatpush3.bf16.msra.mxu1 %v1111_v26  ;;  %1019 = vmatprep.mubr.msk.f32.mxu1 %vm1407_vm0, %v1406_v1  ;;  %v1092_v1 = vpack.c.bf16 %v541_v43, %v540_v42  ;;  %v375_v23 = vshrl.u32 %v374_v22, 7 }
  0x95   : > { %1113 = vmatprep.subr.bf16.mxu1 %v1405_v0 }
  0x96   : > { %1085 = vmatpush3.bf16.msra.mxu0 %v1084_v31  ;;  %v376_v24 = vsub.s32 0, %v375_v23  ;;  %v380_v26 = vsub.s32 1, %v375_v23  ;;  %v384_v27 = vsub.s32 2, %v375_v23 }
  0x97   : > { %1087 = vmatprep.subr.bf16.mxu0 %v1086_v32 }
  0x98   : > { %1115 = vmatpush3.bf16.msra.mxu1 %v1114_v35  ;;  %v377_v28 = vrot.slane %v372_v25, %v376_v24  ;;  %v381_v29 = vrot.slane %v372_v25, %v380_v26  ;;  %v385_v30 = vrot.slane %v372_v25, %v384_v27 }
  0x99   : > { %1116 = vmatprep.subr.bf16.mxu1 %v1405_v0 }
  0x9a   : > { %1089 = vmatpush3.bf16.msra.mxu0 %v1088_v40 }
  0x9b   : > { %1091 = vmatprep.subr.bf16.mxu0 %v1090_v41 }
  0x9c   : > { %1118 = vmatpush3.bf16.msra.mxu1 %v1117_v44 }
  0x9d   : > { %1119 = vmatprep.subr.bf16.mxu1 %v1405_v0 }
  0x9e   : > { %1093 = vmatpush3.bf16.msra.mxu0 %v1092_v1 }
  0x9f   : > { %1095 = vmatprep.subr.bf16.mxu0 %v1094_v49 }
  0xa0   : > { %1121 = vmatpush3.bf16.msra.mxu1 %v1120_v52 }
  0xa1   : > { %1122 = vmatprep.subr.bf16.mxu1 %v1405_v0 }
  0xa2   : > { %1097 = vmatpush3.bf16.msra.mxu0 %v1096_v57 }
  0xa3   : > { %1099 = vmatprep.subr.bf16.mxu0 %v1098_v58 }
  0xa4   : > { %1124 = vmatpush3.bf16.msra.mxu1 %v1123_v61 }
  0xa5   : > { %1125 = vmatprep.subr.bf16.mxu1 %v1405_v0 }
  0xa6   : > { %1101 = vmatpush3.bf16.msra.mxu0 %v1100_v4 }
  0xa7   : > { %1103 = vmatprep.subr.bf16.mxu0 %v1102_v5 }
  0xa8   : > { %1127 = vmatpush3.bf16.msra.mxu1 %v1126_v6 }
  0xa9   : > { %1128 = vmatprep.subr.bf16.mxu1 %v1405_v0 }
  0xaa   : > { %1105 = vmatpush3.bf16.msra.mxu0 %v1104_v9 }
  0xab   : > { %1107 = vmatprep.subr.bf16.mxu0 %v1106_v15 }
  0xac   : > { %1130 = vmatpush3.bf16.msra.mxu1 %v1129_v12 }
  0xad   : > { %1131 = vmatprep.subr.bf16.mxu1 %v1405_v0 }
  0xae   : > { %1109 = vmatpush3.bf16.msra.mxu0 %v1108_v18 }
  0xb0   : > { %1133 = vmatpush3.bf16.msra.mxu1 %v1132_v21 }
 0x164   : > { %v455_v31 = vpop.f32.mrb[0].mxu0 }
 0x165   : > { %v456_v32 = vadd.f32 %v455_v31, %v377_v28  ;;  %v457_v0 = vpop.f32.mrb[1].mxu0 }
 0x166   : > { %v458_v33 = vadd.f32 %v457_v0, %v381_v29  ;;  %v526_v34 = vpop.f32.mrb[0].mxu1 }
 0x167   : > { %v527_v35 = vadd.f32 %v526_v34, %v385_v30  ;;  %v986_v36 = vpop.f32.mrb[1].mxu1  ;;  %v530_v38 = vmax.f32 %v456_v32, 0.0 }
 0x168   : > { %v531_v37 = vmax.f32 %v458_v33, 0.0 }
 0x169   : > { %v532_v39 = vmax.f32 %v527_v35, 0.0 }
 0x16a   : > { %646 = vmatprep.mubr.f32.mxu0 %v531_v37 }
 0x16b   : > { %647 = vmatmul.mubr.f32.vlgmr.msra.gmra.mrb[2].mxu0 %v530_v38  ;;  %1020 = vmatmul.mubr.f32.vlgmr.msra.gmra.mrb[2].mxu1 %v532_v39 }
 0x23e   : > { %v932_v40 = vpop.f32.mrb[2].mxu0  ;;  %v718_v41 = vpop.f32.mrb[2].mxu1 }
 0x23f   : > { %v933_v42 = vpop.f32.mrb[3].mxu0  ;;  %v1021_v43 = vpop.f32.mrb[3].mxu1 }
 0x240   : > { %v934_v44 = vadd.f32 %v933_v42, %v932_v40 }
 0x242   : > { %v719_v46 = vadd.f32 %v934_v44, %v718_v41 }
 0x244   : > { %v735_v47 = vadd.f32 %v878_v45, %v719_v46 }
 0x246   : > { %736 = vst [vmem:[%s310_s9] sm:$0xff] %v735_v47 }
 0x247   : > { %1323 = shalt.err (!%p1320_p11)
}
 0x248   : > { %s1324_s13 = scalar_lea.hbm %s1674_s8, 128  ;;  %s1328_s30 = scalar_lea.hbm %s1728_s5, 256 }
 0x249   : > { %p1325_p0 = scmp.ne.s32.totalorder %s1674_s8, %s1324_s13  ;;  %p1329_p6 = scmp.lt.u32.totalorder %s1674_s8, %s1728_s5 }
 0x24a   : > { %p1330_p7 = scmp.lt.u32.totalorder %s1328_s30, %s1324_s13  ;;  %p1332_p8 = scmp.lt.u32.totalorder %s1324_s13, %s1674_s8 }
 0x24b   : > { %p1326_p4 = pnand %p1325_p0, %p1743_p12 }
 0x24c   : > { %p1331_p2 = por %p1330_p7, %p1329_p6 }
 0x24d   : > { %p1327_p13 = pneg %p1326_p4 }
 0x24e   : > { %p1333_p1 = por %p1332_p8, %p1331_p2 }
 0x250   : > { %p1334_p10 = pnand %p1333_p1, %p1327_p13 }
 0x252   : > { %1337 = shalt.err (!%p1334_p10)
}
 0x253   : > { %1144 = dma.vmem_to_hbm [thread:$0]  (%p1743_p12), %s1676_s11, 128, %s1674_s8, %s738_s10  }
 0x254 PF: > { %s763_s9 = sand.u32 1, %s1376_s18   ;;  %p1744_p3 = scmp.ne.s32.totalorder %s1736_s29, 0 }
 0x255   : > { %p1745_p5 = scmp.ge.s32.totalorder %s1396_s23, 2  ;;  %s764_s15 = scalar_lea.sflag [#allocation5], %s763_s9 }
 0x257   : > { %p1158_p9 = pnand %p1745_p5, %p1744_p3 }
 0x259   : > { %1371 = dma.done.wait (!%p1158_p9), %s764_s15, 128  }
 0x25a   : > { %1373 = vsyncadd (!%p1158_p9), %s764_s15, 4294967168  ;;  %s22_s23 = sadd.s32 1, %s1396_s23   ;;  %s1746_s18 = smov %s1380_s19 }
 0x25b   : > { %p19_p11 = scmp.ge.s32.totalorder %s22_s23, 4   ;;  %s1747_s19 = smov %s1384_s20 }
 0x25c   : > { %s1748_s20 = smov %s1581_s17  ;;  %s1749_s21 = smov %s1392_s22 }
 0x25d   : > { %s1750_s22 = smov %s1752_s12  ;;  %21 = sbr.rel (!%p19_p11) target bundleno = 7 (0x7), region = 106 }
 0x264   :  { %769 = vsyncpa [#allocation4], 1 }
 0x265   :  { %771 = vsyncpa [#allocation4 + $0x1], 1 }
 0x266   :  { %772 = vsyncpa [#allocation7], 1 }
 0x267   :  { %773 = vsyncpa [#allocation5], 1 }
 0x268   :  { %775 = vsyncpa [#allocation5 + $0x1], 1 }

</bundles_post_ra>
